<compile_context>
chip_gen: v7x
topology: tpu7x:2x2x1
jax: 0.10.0
libtpu: 0.0.40
codegen_flags: <defaults>
</compile_context>

<pallas_src>
import jax
import jax.numpy as jnp
from jax.experimental import pallas as pl
from jax.experimental.pallas import tpu as pltpu


def _agru_kernel(nf_ref, proj_ref, g_ref, mem_ref, uru_ref, bias_ref, out_ref):
    """Single invocation (no grid). Runs the whole recurrence in VMEM.

    nf_ref   : (B, 1)      int32  num_facts
    proj_ref : (T, B, 2Da) f32    fact @ [Wr^T | W^T]  (hoisted projection)
    g_ref    : (T, B, 1)   f32    attention gates (time-major)
    mem_ref  : (B, Da)     f32    h0
    uru_ref  : (Da, 2Da)   f32    [Ur^T | U^T]
    bias_ref : (1, 2Da)    f32    [Ur_b | U_b]
    out_ref  : (B, Da)     f32    hidden state after step num_facts-1
    """
    T = proj_ref.shape[0]
    Da = out_ref.shape[1]

    nf = nf_ref[...]          # (B, 1) i32
    uru = uru_ref[...]        # (Da, 2Da) — loaded once, reused every step
    bias = bias_ref[...]      # (1, 2Da)
    h0 = mem_ref[...]         # (B, Da)
    out0 = jnp.zeros(out_ref.shape, out_ref.dtype)

    def step(t, carry):
        h, out = carry
        proj_t = proj_ref[t]                       # (B, 2Da) leading-axis index
        gv = g_ref[t]                              # (B, 1)
        # One fused recurrent matmul per step (includes both biases).
        rec = jnp.dot(h, uru, preferred_element_type=jnp.float32) + bias
        r = jax.nn.sigmoid(proj_t[:, :Da] + rec[:, :Da])
        h_cand = jnp.tanh(proj_t[:, Da:] + r * rec[:, Da:])
        h_new = gv * h_cand + (1.0 - gv) * h
        # Snapshot the state right after step (num_facts - 1); stays in vregs.
        out_new = jnp.where((nf - 1) == t, h_new, out)
        return h_new, out_new

    # Short fixed trip count -> fully unrolled for LLO scheduler visibility.
    _, out_fin = jax.lax.fori_loop(0, T, step, (h0, out0), unroll=True)
    out_ref[...] = out_fin


def attention_gru_pallas(facts, num_facts, g, mem_old, params):
    """facts (B,T,Dr) f32, num_facts (B,) i32, g (B,T,1) f32, mem_old (B,1,Da) f32."""
    B, T, Dr = facts.shape
    Da = params["Ur_w"].shape[0]
    f32 = jnp.float32

    # PyTorch Linear: y = x @ W.T + b  ->  pass W.T as (in, out); fuse gate pairs.
    wrw = jnp.concatenate([params["Wr_w"].T, params["W_w"].T], axis=1).astype(f32)   # (Dr, 2Da)
    uru = jnp.concatenate([params["Ur_w"].T, params["U_w"].T], axis=1).astype(f32)   # (Da, 2Da)
    bias = jnp.concatenate([params["Ur_b"], params["U_b"]]).reshape(1, 2 * Da).astype(f32)

    # Hoisted input projection: one (B*T, Dr) @ (Dr, 2Da) matmul for the whole
    # sequence, emitted time-major so the serial loop only does h @ [Ur|U].
    proj = jnp.einsum("btd,de->tbe", facts.astype(f32), wrw)                         # (T, B, 2Da)
    g_tm = jnp.transpose(g.astype(f32), (1, 0, 2))                                   # (T, B, 1), tiny
    mem = mem_old[:, 0, :].astype(f32)                                               # (B, Da)
    nf = jnp.asarray(num_facts, jnp.int32).reshape(B, 1)                             # (B, 1)

    vmem = pl.BlockSpec(memory_space=pltpu.MemorySpace.VMEM)
    out = pl.pallas_call(
        _agru_kernel,
        out_shape=jax.ShapeDtypeStruct((B, Da), f32),
        in_specs=[vmem, vmem, vmem, vmem, vmem, vmem],
        out_specs=vmem,
    )(nf, proj, g_tm, mem, uru, bias)
    return out


def attention_gru_reference(facts, num_facts, g, mem_old, params):
    """Pure-JAX re-statement of the PyTorch forward, for verification."""
    B, T, _ = facts.shape
    h = mem_old[:, 0, :]
    states = []
    for i in range(T):
        fact = facts[:, i]
        gv = g[:, i]
        r = jax.nn.sigmoid(fact @ params["Wr_w"].T + h @ params["Ur_w"].T + params["Ur_b"])
        h_t = jnp.tanh(fact @ params["W_w"].T
                       + r * (h @ params["U_w"].T + params["U_b"]))
        h = gv * h_t + (1.0 - gv) * h
        states.append(h)
    states = jnp.stack(states, axis=1)                      # (B, T, Da)
    return jnp.stack([states[b, int(num_facts[b]) - 1] for b in range(B)])


def make_params(key, rep_dim, agru_dim):
    ks = jax.random.split(key, 6)
    s = 0.1
    return {
        "Wr_w": s * jax.random.normal(ks[0], (agru_dim, rep_dim), jnp.float32),
        "Ur_w": s * jax.random.normal(ks[1], (agru_dim, agru_dim), jnp.float32),
        "Ur_b": s * jax.random.normal(ks[2], (agru_dim,), jnp.float32),
        "W_w": s * jax.random.normal(ks[3], (agru_dim, rep_dim), jnp.float32),
        "U_w": s * jax.random.normal(ks[4], (agru_dim, agru_dim), jnp.float32),
        "U_b": s * jax.random.normal(ks[5], (agru_dim,), jnp.float32),
    }


if __name__ == "__main__":
    # Small shapes: batch=2, seq(max_facts_len)=8, rep_dim=agru_dim=32
    # (the PyTorch module feeds mem_old directly as h0, so rep_dim == agru_dim).
    B, T, Dr, Da = 2, 8, 32, 32
    key = jax.random.PRNGKey(0)
    k_f, k_g, k_m, k_p = jax.random.split(key, 4)

    facts = jax.random.normal(k_f, (B, T, Dr), jnp.float32)
    g = jax.nn.sigmoid(jax.random.normal(k_g, (B, T, 1), jnp.float32))
    mem_old = jax.random.normal(k_m, (B, 1, Da), jnp.float32)
    num_facts = jnp.array([8, 5], jnp.int32)
    params = make_params(k_p, Dr, Da)

    out = attention_gru_pallas(facts, num_facts, g, mem_old, params)
    out = jax.block_until_ready(out)

    ref = attention_gru_reference(facts, num_facts, g, mem_old, params)
    assert out.shape == (B, Da)
    assert jnp.allclose(out, ref, atol=1e-4, rtol=1e-4), "mismatch vs reference"

    print("KERNEL_OK")
</pallas_src>

<mosaic_0001>
module attributes {stable_mosaic.version = 11 : i64} {
  func.func @_agru_kernel(%arg0: memref<2x1xi32, #tpu.memory_space<vmem>>, %arg1: memref<8x2x64xf32, #tpu.memory_space<vmem>>, %arg2: memref<8x2x1xf32, #tpu.memory_space<vmem>>, %arg3: memref<2x32xf32, #tpu.memory_space<vmem>>, %arg4: memref<32x64xf32, #tpu.memory_space<vmem>>, %arg5: memref<1x64xf32, #tpu.memory_space<vmem>>, %arg6: memref<2x32xf32, #tpu.memory_space<vmem>>) attributes {dimension_semantics = [], scalar_prefetch = 0 : i64, scratch_operands = 0 : i64, tpu.core_type = #tpu.core_type<tc>} {
    %c0 = arith.constant 0 : index
    %c0_0 = arith.constant 0 : index
    %0 = vector.load %arg0[%c0, %c0_0] : memref<2x1xi32, #tpu.memory_space<vmem>>, vector<2x1xi32>
    %c0_1 = arith.constant 0 : index
    %c0_2 = arith.constant 0 : index
    %1 = vector.load %arg4[%c0_1, %c0_2] : memref<32x64xf32, #tpu.memory_space<vmem>>, vector<32x64xf32>
    %c0_3 = arith.constant 0 : index
    %c0_4 = arith.constant 0 : index
    %2 = vector.load %arg5[%c0_3, %c0_4] : memref<1x64xf32, #tpu.memory_space<vmem>>, vector<1x64xf32>
    %c0_5 = arith.constant 0 : index
    %c0_6 = arith.constant 0 : index
    %3 = vector.load %arg3[%c0_5, %c0_6] : memref<2x32xf32, #tpu.memory_space<vmem>>, vector<2x32xf32>
    %cst = arith.constant 0.000000e+00 : f32
    %4 = vector.broadcast %cst : f32 to vector<2x32xf32>
    %c0_i32 = arith.constant 0 : i32
    %5 = arith.index_cast %c0_i32 : i32 to index
    %c0_7 = arith.constant 0 : index
    %c0_8 = arith.constant 0 : index
    %6 = vector.load %arg1[%5, %c0_7, %c0_8] : memref<8x2x64xf32, #tpu.memory_space<vmem>>, vector<1x2x64xf32>
    %7 = vector.shape_cast %6 : vector<1x2x64xf32> to vector<2x64xf32>
    %8 = arith.index_cast %c0_i32 : i32 to index
    %c0_9 = arith.constant 0 : index
    %c0_10 = arith.constant 0 : index
    %9 = vector.load %arg2[%8, %c0_9, %c0_10] : memref<8x2x1xf32, #tpu.memory_space<vmem>>, vector<1x2x1xf32>
    %10 = vector.shape_cast %9 : vector<1x2x1xf32> to vector<2x1xf32>
    %cst_11 = arith.constant dense<0.000000e+00> : vector<2x64xf32>
    %11 = tpu.matmul %3, %1, %cst_11 {dimension_numbers = #tpu.dot_dimension_numbers<[1], [0], [0], [1], [0, 0, 1, 1], [], []>} : vector<2x32xf32>, vector<32x64xf32>, vector<2x64xf32> -> vector<2x64xf32>
    %12 = vector.broadcast %2 : vector<1x64xf32> to vector<2x64xf32>
    %13 = arith.addf %11, %12 : vector<2x64xf32>
    %14 = vector.extract_strided_slice %7 {offsets = [0, 0], sizes = [2, 32], strides = [1, 1]} : vector<2x64xf32> to vector<2x32xf32>
    %15 = vector.extract_strided_slice %13 {offsets = [0, 0], sizes = [2, 32], strides = [1, 1]} : vector<2x64xf32> to vector<2x32xf32>
    %16 = arith.addf %14, %15 : vector<2x32xf32>
    %17 = arith.negf %16 : vector<2x32xf32>
    %18 = math.exp %17 : vector<2x32xf32>
    %cst_12 = arith.constant 1.000000e+00 : f32
    %19 = vector.broadcast %cst_12 : f32 to vector<2x32xf32>
    %20 = arith.addf %19, %18 : vector<2x32xf32>
    %21 = arith.divf %19, %20 : vector<2x32xf32>
    %22 = vector.extract_strided_slice %7 {offsets = [0, 32], sizes = [2, 32], strides = [1, 1]} : vector<2x64xf32> to vector<2x32xf32>
    %23 = vector.extract_strided_slice %13 {offsets = [0, 32], sizes = [2, 32], strides = [1, 1]} : vector<2x64xf32> to vector<2x32xf32>
    %24 = arith.mulf %21, %23 : vector<2x32xf32>
    %25 = arith.addf %22, %24 : vector<2x32xf32>
    %26 = math.tanh %25 : vector<2x32xf32>
    %27 = vector.broadcast %10 : vector<2x1xf32> to vector<2x32xf32>
    %28 = arith.mulf %27, %26 : vector<2x32xf32>
    %cst_13 = arith.constant 1.000000e+00 : f32
    %29 = vector.broadcast %cst_13 : f32 to vector<2x1xf32>
    %30 = arith.subf %29, %10 : vector<2x1xf32>
    %31 = vector.broadcast %30 : vector<2x1xf32> to vector<2x32xf32>
    %32 = arith.mulf %31, %3 : vector<2x32xf32>
    %33 = arith.addf %28, %32 : vector<2x32xf32>
    %c1_i32 = arith.constant 1 : i32
    %34 = vector.broadcast %c1_i32 : i32 to vector<2x1xi32>
    %35 = arith.subi %0, %34 : vector<2x1xi32>
    %36 = vector.broadcast %c0_i32 : i32 to vector<2x1xi32>
    %37 = arith.cmpi eq, %35, %36 : vector<2x1xi32>
    %38 = vector.shape_cast %37 : vector<2x1xi1> to vector<2x1xi1>
    %39 = vector.broadcast %38 : vector<2x1xi1> to vector<2x32xi1>
    %40 = arith.select %39, %33, %4 : vector<2x32xi1>, vector<2x32xf32>
    %c1_i32_14 = arith.constant 1 : i32
    %41 = arith.index_cast %c1_i32_14 : i32 to index
    %c0_15 = arith.constant 0 : index
    %c0_16 = arith.constant 0 : index
    %42 = vector.load %arg1[%41, %c0_15, %c0_16] : memref<8x2x64xf32, #tpu.memory_space<vmem>>, vector<1x2x64xf32>
    %43 = vector.shape_cast %42 : vector<1x2x64xf32> to vector<2x64xf32>
    %44 = arith.index_cast %c1_i32_14 : i32 to index
    %c0_17 = arith.constant 0 : index
    %c0_18 = arith.constant 0 : index
    %45 = vector.load %arg2[%44, %c0_17, %c0_18] : memref<8x2x1xf32, #tpu.memory_space<vmem>>, vector<1x2x1xf32>
    %46 = vector.shape_cast %45 : vector<1x2x1xf32> to vector<2x1xf32>
    %cst_19 = arith.constant dense<0.000000e+00> : vector<2x64xf32>
    %47 = tpu.matmul %33, %1, %cst_19 {dimension_numbers = #tpu.dot_dimension_numbers<[1], [0], [0], [1], [0, 0, 1, 1], [], []>} : vector<2x32xf32>, vector<32x64xf32>, vector<2x64xf32> -> vector<2x64xf32>
    %48 = vector.broadcast %2 : vector<1x64xf32> to vector<2x64xf32>
    %49 = arith.addf %47, %48 : vector<2x64xf32>
    %50 = vector.extract_strided_slice %43 {offsets = [0, 0], sizes = [2, 32], strides = [1, 1]} : vector<2x64xf32> to vector<2x32xf32>
    %51 = vector.extract_strided_slice %49 {offsets = [0, 0], sizes = [2, 32], strides = [1, 1]} : vector<2x64xf32> to vector<2x32xf32>
    %52 = arith.addf %50, %51 : vector<2x32xf32>
    %53 = arith.negf %52 : vector<2x32xf32>
    %54 = math.exp %53 : vector<2x32xf32>
    %cst_20 = arith.constant 1.000000e+00 : f32
    %55 = vector.broadcast %cst_20 : f32 to vector<2x32xf32>
    %56 = arith.addf %55, %54 : vector<2x32xf32>
    %57 = arith.divf %55, %56 : vector<2x32xf32>
    %58 = vector.extract_strided_slice %43 {offsets = [0, 32], sizes = [2, 32], strides = [1, 1]} : vector<2x64xf32> to vector<2x32xf32>
    %59 = vector.extract_strided_slice %49 {offsets = [0, 32], sizes = [2, 32], strides = [1, 1]} : vector<2x64xf32> to vector<2x32xf32>
    %60 = arith.mulf %57, %59 : vector<2x32xf32>
    %61 = arith.addf %58, %60 : vector<2x32xf32>
    %62 = math.tanh %61 : vector<2x32xf32>
    %63 = vector.broadcast %46 : vector<2x1xf32> to vector<2x32xf32>
    %64 = arith.mulf %63, %62 : vector<2x32xf32>
    %cst_21 = arith.constant 1.000000e+00 : f32
    %65 = vector.broadcast %cst_21 : f32 to vector<2x1xf32>
    %66 = arith.subf %65, %46 : vector<2x1xf32>
    %67 = vector.broadcast %66 : vector<2x1xf32> to vector<2x32xf32>
    %68 = arith.mulf %67, %33 : vector<2x32xf32>
    %69 = arith.addf %64, %68 : vector<2x32xf32>
    %c1_i32_22 = arith.constant 1 : i32
    %70 = vector.broadcast %c1_i32_22 : i32 to vector<2x1xi32>
    %71 = arith.subi %0, %70 : vector<2x1xi32>
    %72 = vector.broadcast %c1_i32_14 : i32 to vector<2x1xi32>
    %73 = arith.cmpi eq, %71, %72 : vector<2x1xi32>
    %74 = vector.shape_cast %73 : vector<2x1xi1> to vector<2x1xi1>
    %75 = vector.broadcast %74 : vector<2x1xi1> to vector<2x32xi1>
    %76 = arith.select %75, %69, %40 : vector<2x32xi1>, vector<2x32xf32>
    %c2_i32 = arith.constant 2 : i32
    %77 = arith.index_cast %c2_i32 : i32 to index
    %c0_23 = arith.constant 0 : index
    %c0_24 = arith.constant 0 : index
    %78 = vector.load %arg1[%77, %c0_23, %c0_24] : memref<8x2x64xf32, #tpu.memory_space<vmem>>, vector<1x2x64xf32>
    %79 = vector.shape_cast %78 : vector<1x2x64xf32> to vector<2x64xf32>
    %80 = arith.index_cast %c2_i32 : i32 to index
    %c0_25 = arith.constant 0 : index
    %c0_26 = arith.constant 0 : index
    %81 = vector.load %arg2[%80, %c0_25, %c0_26] : memref<8x2x1xf32, #tpu.memory_space<vmem>>, vector<1x2x1xf32>
    %82 = vector.shape_cast %81 : vector<1x2x1xf32> to vector<2x1xf32>
    %cst_27 = arith.constant dense<0.000000e+00> : vector<2x64xf32>
    %83 = tpu.matmul %69, %1, %cst_27 {dimension_numbers = #tpu.dot_dimension_numbers<[1], [0], [0], [1], [0, 0, 1, 1], [], []>} : vector<2x32xf32>, vector<32x64xf32>, vector<2x64xf32> -> vector<2x64xf32>
    %84 = vector.broadcast %2 : vector<1x64xf32> to vector<2x64xf32>
    %85 = arith.addf %83, %84 : vector<2x64xf32>
    %86 = vector.extract_strided_slice %79 {offsets = [0, 0], sizes = [2, 32], strides = [1, 1]} : vector<2x64xf32> to vector<2x32xf32>
    %87 = vector.extract_strided_slice %85 {offsets = [0, 0], sizes = [2, 32], strides = [1, 1]} : vector<2x64xf32> to vector<2x32xf32>
    %88 = arith.addf %86, %87 : vector<2x32xf32>
    %89 = arith.negf %88 : vector<2x32xf32>
    %90 = math.exp %89 : vector<2x32xf32>
    %cst_28 = arith.constant 1.000000e+00 : f32
    %91 = vector.broadcast %cst_28 : f32 to vector<2x32xf32>
    %92 = arith.addf %91, %90 : vector<2x32xf32>
    %93 = arith.divf %91, %92 : vector<2x32xf32>
    %94 = vector.extract_strided_slice %79 {offsets = [0, 32], sizes = [2, 32], strides = [1, 1]} : vector<2x64xf32> to vector<2x32xf32>
    %95 = vector.extract_strided_slice %85 {offsets = [0, 32], sizes = [2, 32], strides = [1, 1]} : vector<2x64xf32> to vector<2x32xf32>
    %96 = arith.mulf %93, %95 : vector<2x32xf32>
    %97 = arith.addf %94, %96 : vector<2x32xf32>
    %98 = math.tanh %97 : vector<2x32xf32>
    %99 = vector.broadcast %82 : vector<2x1xf32> to vector<2x32xf32>
    %100 = arith.mulf %99, %98 : vector<2x32xf32>
    %cst_29 = arith.constant 1.000000e+00 : f32
    %101 = vector.broadcast %cst_29 : f32 to vector<2x1xf32>
    %102 = arith.subf %101, %82 : vector<2x1xf32>
    %103 = vector.broadcast %102 : vector<2x1xf32> to vector<2x32xf32>
    %104 = arith.mulf %103, %69 : vector<2x32xf32>
    %105 = arith.addf %100, %104 : vector<2x32xf32>
    %c1_i32_30 = arith.constant 1 : i32
    %106 = vector.broadcast %c1_i32_30 : i32 to vector<2x1xi32>
    %107 = arith.subi %0, %106 : vector<2x1xi32>
    %108 = vector.broadcast %c2_i32 : i32 to vector<2x1xi32>
    %109 = arith.cmpi eq, %107, %108 : vector<2x1xi32>
    %110 = vector.shape_cast %109 : vector<2x1xi1> to vector<2x1xi1>
    %111 = vector.broadcast %110 : vector<2x1xi1> to vector<2x32xi1>
    %112 = arith.select %111, %105, %76 : vector<2x32xi1>, vector<2x32xf32>
    %c3_i32 = arith.constant 3 : i32
    %113 = arith.index_cast %c3_i32 : i32 to index
    %c0_31 = arith.constant 0 : index
    %c0_32 = arith.constant 0 : index
    %114 = vector.load %arg1[%113, %c0_31, %c0_32] : memref<8x2x64xf32, #tpu.memory_space<vmem>>, vector<1x2x64xf32>
    %115 = vector.shape_cast %114 : vector<1x2x64xf32> to vector<2x64xf32>
    %116 = arith.index_cast %c3_i32 : i32 to index
    %c0_33 = arith.constant 0 : index
    %c0_34 = arith.constant 0 : index
    %117 = vector.load %arg2[%116, %c0_33, %c0_34] : memref<8x2x1xf32, #tpu.memory_space<vmem>>, vector<1x2x1xf32>
    %118 = vector.shape_cast %117 : vector<1x2x1xf32> to vector<2x1xf32>
    %cst_35 = arith.constant dense<0.000000e+00> : vector<2x64xf32>
    %119 = tpu.matmul %105, %1, %cst_35 {dimension_numbers = #tpu.dot_dimension_numbers<[1], [0], [0], [1], [0, 0, 1, 1], [], []>} : vector<2x32xf32>, vector<32x64xf32>, vector<2x64xf32> -> vector<2x64xf32>
    %120 = vector.broadcast %2 : vector<1x64xf32> to vector<2x64xf32>
    %121 = arith.addf %119, %120 : vector<2x64xf32>
    %122 = vector.extract_strided_slice %115 {offsets = [0, 0], sizes = [2, 32], strides = [1, 1]} : vector<2x64xf32> to vector<2x32xf32>
    %123 = vector.extract_strided_slice %121 {offsets = [0, 0], sizes = [2, 32], strides = [1, 1]} : vector<2x64xf32> to vector<2x32xf32>
    %124 = arith.addf %122, %123 : vector<2x32xf32>
    %125 = arith.negf %124 : vector<2x32xf32>
    %126 = math.exp %125 : vector<2x32xf32>
    %cst_36 = arith.constant 1.000000e+00 : f32
    %127 = vector.broadcast %cst_36 : f32 to vector<2x32xf32>
    %128 = arith.addf %127, %126 : vector<2x32xf32>
    %129 = arith.divf %127, %128 : vector<2x32xf32>
    %130 = vector.extract_strided_slice %115 {offsets = [0, 32], sizes = [2, 32], strides = [1, 1]} : vector<2x64xf32> to vector<2x32xf32>
    %131 = vector.extract_strided_slice %121 {offsets = [0, 32], sizes = [2, 32], strides = [1, 1]} : vector<2x64xf32> to vector<2x32xf32>
    %132 = arith.mulf %129, %131 : vector<2x32xf32>
    %133 = arith.addf %130, %132 : vector<2x32xf32>
    %134 = math.tanh %133 : vector<2x32xf32>
    %135 = vector.broadcast %118 : vector<2x1xf32> to vector<2x32xf32>
    %136 = arith.mulf %135, %134 : vector<2x32xf32>
    %cst_37 = arith.constant 1.000000e+00 : f32
    %137 = vector.broadcast %cst_37 : f32 to vector<2x1xf32>
    %138 = arith.subf %137, %118 : vector<2x1xf32>
    %139 = vector.broadcast %138 : vector<2x1xf32> to vector<2x32xf32>
    %140 = arith.mulf %139, %105 : vector<2x32xf32>
    %141 = arith.addf %136, %140 : vector<2x32xf32>
    %c1_i32_38 = arith.constant 1 : i32
    %142 = vector.broadcast %c1_i32_38 : i32 to vector<2x1xi32>
    %143 = arith.subi %0, %142 : vector<2x1xi32>
    %144 = vector.broadcast %c3_i32 : i32 to vector<2x1xi32>
    %145 = arith.cmpi eq, %143, %144 : vector<2x1xi32>
    %146 = vector.shape_cast %145 : vector<2x1xi1> to vector<2x1xi1>
    %147 = vector.broadcast %146 : vector<2x1xi1> to vector<2x32xi1>
    %148 = arith.select %147, %141, %112 : vector<2x32xi1>, vector<2x32xf32>
    %c4_i32 = arith.constant 4 : i32
    %149 = arith.index_cast %c4_i32 : i32 to index
    %c0_39 = arith.constant 0 : index
    %c0_40 = arith.constant 0 : index
    %150 = vector.load %arg1[%149, %c0_39, %c0_40] : memref<8x2x64xf32, #tpu.memory_space<vmem>>, vector<1x2x64xf32>
    %151 = vector.shape_cast %150 : vector<1x2x64xf32> to vector<2x64xf32>
    %152 = arith.index_cast %c4_i32 : i32 to index
    %c0_41 = arith.constant 0 : index
    %c0_42 = arith.constant 0 : index
    %153 = vector.load %arg2[%152, %c0_41, %c0_42] : memref<8x2x1xf32, #tpu.memory_space<vmem>>, vector<1x2x1xf32>
    %154 = vector.shape_cast %153 : vector<1x2x1xf32> to vector<2x1xf32>
    %cst_43 = arith.constant dense<0.000000e+00> : vector<2x64xf32>
    %155 = tpu.matmul %141, %1, %cst_43 {dimension_numbers = #tpu.dot_dimension_numbers<[1], [0], [0], [1], [0, 0, 1, 1], [], []>} : vector<2x32xf32>, vector<32x64xf32>, vector<2x64xf32> -> vector<2x64xf32>
    %156 = vector.broadcast %2 : vector<1x64xf32> to vector<2x64xf32>
    %157 = arith.addf %155, %156 : vector<2x64xf32>
    %158 = vector.extract_strided_slice %151 {offsets = [0, 0], sizes = [2, 32], strides = [1, 1]} : vector<2x64xf32> to vector<2x32xf32>
    %159 = vector.extract_strided_slice %157 {offsets = [0, 0], sizes = [2, 32], strides = [1, 1]} : vector<2x64xf32> to vector<2x32xf32>
    %160 = arith.addf %158, %159 : vector<2x32xf32>
    %161 = arith.negf %160 : vector<2x32xf32>
    %162 = math.exp %161 : vector<2x32xf32>
    %cst_44 = arith.constant 1.000000e+00 : f32
    %163 = vector.broadcast %cst_44 : f32 to vector<2x32xf32>
    %164 = arith.addf %163, %162 : vector<2x32xf32>
    %165 = arith.divf %163, %164 : vector<2x32xf32>
    %166 = vector.extract_strided_slice %151 {offsets = [0, 32], sizes = [2, 32], strides = [1, 1]} : vector<2x64xf32> to vector<2x32xf32>
    %167 = vector.extract_strided_slice %157 {offsets = [0, 32], sizes = [2, 32], strides = [1, 1]} : vector<2x64xf32> to vector<2x32xf32>
    %168 = arith.mulf %165, %167 : vector<2x32xf32>
    %169 = arith.addf %166, %168 : vector<2x32xf32>
    %170 = math.tanh %169 : vector<2x32xf32>
    %171 = vector.broadcast %154 : vector<2x1xf32> to vector<2x32xf32>
    %172 = arith.mulf %171, %170 : vector<2x32xf32>
    %cst_45 = arith.constant 1.000000e+00 : f32
    %173 = vector.broadcast %cst_45 : f32 to vector<2x1xf32>
    %174 = arith.subf %173, %154 : vector<2x1xf32>
    %175 = vector.broadcast %174 : vector<2x1xf32> to vector<2x32xf32>
    %176 = arith.mulf %175, %141 : vector<2x32xf32>
    %177 = arith.addf %172, %176 : vector<2x32xf32>
    %c1_i32_46 = arith.constant 1 : i32
    %178 = vector.broadcast %c1_i32_46 : i32 to vector<2x1xi32>
    %179 = arith.subi %0, %178 : vector<2x1xi32>
    %180 = vector.broadcast %c4_i32 : i32 to vector<2x1xi32>
    %181 = arith.cmpi eq, %179, %180 : vector<2x1xi32>
    %182 = vector.shape_cast %181 : vector<2x1xi1> to vector<2x1xi1>
    %183 = vector.broadcast %182 : vector<2x1xi1> to vector<2x32xi1>
    %184 = arith.select %183, %177, %148 : vector<2x32xi1>, vector<2x32xf32>
    %c5_i32 = arith.constant 5 : i32
    %185 = arith.index_cast %c5_i32 : i32 to index
    %c0_47 = arith.constant 0 : index
    %c0_48 = arith.constant 0 : index
    %186 = vector.load %arg1[%185, %c0_47, %c0_48] : memref<8x2x64xf32, #tpu.memory_space<vmem>>, vector<1x2x64xf32>
    %187 = vector.shape_cast %186 : vector<1x2x64xf32> to vector<2x64xf32>
    %188 = arith.index_cast %c5_i32 : i32 to index
    %c0_49 = arith.constant 0 : index
    %c0_50 = arith.constant 0 : index
    %189 = vector.load %arg2[%188, %c0_49, %c0_50] : memref<8x2x1xf32, #tpu.memory_space<vmem>>, vector<1x2x1xf32>
    %190 = vector.shape_cast %189 : vector<1x2x1xf32> to vector<2x1xf32>
    %cst_51 = arith.constant dense<0.000000e+00> : vector<2x64xf32>
    %191 = tpu.matmul %177, %1, %cst_51 {dimension_numbers = #tpu.dot_dimension_numbers<[1], [0], [0], [1], [0, 0, 1, 1], [], []>} : vector<2x32xf32>, vector<32x64xf32>, vector<2x64xf32> -> vector<2x64xf32>
    %192 = vector.broadcast %2 : vector<1x64xf32> to vector<2x64xf32>
    %193 = arith.addf %191, %192 : vector<2x64xf32>
    %194 = vector.extract_strided_slice %187 {offsets = [0, 0], sizes = [2, 32], strides = [1, 1]} : vector<2x64xf32> to vector<2x32xf32>
    %195 = vector.extract_strided_slice %193 {offsets = [0, 0], sizes = [2, 32], strides = [1, 1]} : vector<2x64xf32> to vector<2x32xf32>
    %196 = arith.addf %194, %195 : vector<2x32xf32>
    %197 = arith.negf %196 : vector<2x32xf32>
    %198 = math.exp %197 : vector<2x32xf32>
    %cst_52 = arith.constant 1.000000e+00 : f32
    %199 = vector.broadcast %cst_52 : f32 to vector<2x32xf32>
    %200 = arith.addf %199, %198 : vector<2x32xf32>
    %201 = arith.divf %199, %200 : vector<2x32xf32>
    %202 = vector.extract_strided_slice %187 {offsets = [0, 32], sizes = [2, 32], strides = [1, 1]} : vector<2x64xf32> to vector<2x32xf32>
    %203 = vector.extract_strided_slice %193 {offsets = [0, 32], sizes = [2, 32], strides = [1, 1]} : vector<2x64xf32> to vector<2x32xf32>
    %204 = arith.mulf %201, %203 : vector<2x32xf32>
    %205 = arith.addf %202, %204 : vector<2x32xf32>
    %206 = math.tanh %205 : vector<2x32xf32>
    %207 = vector.broadcast %190 : vector<2x1xf32> to vector<2x32xf32>
    %208 = arith.mulf %207, %206 : vector<2x32xf32>
    %cst_53 = arith.constant 1.000000e+00 : f32
    %209 = vector.broadcast %cst_53 : f32 to vector<2x1xf32>
    %210 = arith.subf %209, %190 : vector<2x1xf32>
    %211 = vector.broadcast %210 : vector<2x1xf32> to vector<2x32xf32>
    %212 = arith.mulf %211, %177 : vector<2x32xf32>
    %213 = arith.addf %208, %212 : vector<2x32xf32>
    %c1_i32_54 = arith.constant 1 : i32
    %214 = vector.broadcast %c1_i32_54 : i32 to vector<2x1xi32>
    %215 = arith.subi %0, %214 : vector<2x1xi32>
    %216 = vector.broadcast %c5_i32 : i32 to vector<2x1xi32>
    %217 = arith.cmpi eq, %215, %216 : vector<2x1xi32>
    %218 = vector.shape_cast %217 : vector<2x1xi1> to vector<2x1xi1>
    %219 = vector.broadcast %218 : vector<2x1xi1> to vector<2x32xi1>
    %220 = arith.select %219, %213, %184 : vector<2x32xi1>, vector<2x32xf32>
    %c6_i32 = arith.constant 6 : i32
    %221 = arith.index_cast %c6_i32 : i32 to index
    %c0_55 = arith.constant 0 : index
    %c0_56 = arith.constant 0 : index
    %222 = vector.load %arg1[%221, %c0_55, %c0_56] : memref<8x2x64xf32, #tpu.memory_space<vmem>>, vector<1x2x64xf32>
    %223 = vector.shape_cast %222 : vector<1x2x64xf32> to vector<2x64xf32>
    %224 = arith.index_cast %c6_i32 : i32 to index
    %c0_57 = arith.constant 0 : index
    %c0_58 = arith.constant 0 : index
    %225 = vector.load %arg2[%224, %c0_57, %c0_58] : memref<8x2x1xf32, #tpu.memory_space<vmem>>, vector<1x2x1xf32>
    %226 = vector.shape_cast %225 : vector<1x2x1xf32> to vector<2x1xf32>
    %cst_59 = arith.constant dense<0.000000e+00> : vector<2x64xf32>
    %227 = tpu.matmul %213, %1, %cst_59 {dimension_numbers = #tpu.dot_dimension_numbers<[1], [0], [0], [1], [0, 0, 1, 1], [], []>} : vector<2x32xf32>, vector<32x64xf32>, vector<2x64xf32> -> vector<2x64xf32>
    %228 = vector.broadcast %2 : vector<1x64xf32> to vector<2x64xf32>
    %229 = arith.addf %227, %228 : vector<2x64xf32>
    %230 = vector.extract_strided_slice %223 {offsets = [0, 0], sizes = [2, 32], strides = [1, 1]} : vector<2x64xf32> to vector<2x32xf32>
    %231 = vector.extract_strided_slice %229 {offsets = [0, 0], sizes = [2, 32], strides = [1, 1]} : vector<2x64xf32> to vector<2x32xf32>
    %232 = arith.addf %230, %231 : vector<2x32xf32>
    %233 = arith.negf %232 : vector<2x32xf32>
    %234 = math.exp %233 : vector<2x32xf32>
    %cst_60 = arith.constant 1.000000e+00 : f32
    %235 = vector.broadcast %cst_60 : f32 to vector<2x32xf32>
    %236 = arith.addf %235, %234 : vector<2x32xf32>
    %237 = arith.divf %235, %236 : vector<2x32xf32>
    %238 = vector.extract_strided_slice %223 {offsets = [0, 32], sizes = [2, 32], strides = [1, 1]} : vector<2x64xf32> to vector<2x32xf32>
    %239 = vector.extract_strided_slice %229 {offsets = [0, 32], sizes = [2, 32], strides = [1, 1]} : vector<2x64xf32> to vector<2x32xf32>
    %240 = arith.mulf %237, %239 : vector<2x32xf32>
    %241 = arith.addf %238, %240 : vector<2x32xf32>
    %242 = math.tanh %241 : vector<2x32xf32>
    %243 = vector.broadcast %226 : vector<2x1xf32> to vector<2x32xf32>
    %244 = arith.mulf %243, %242 : vector<2x32xf32>
    %cst_61 = arith.constant 1.000000e+00 : f32
    %245 = vector.broadcast %cst_61 : f32 to vector<2x1xf32>
    %246 = arith.subf %245, %226 : vector<2x1xf32>
    %247 = vector.broadcast %246 : vector<2x1xf32> to vector<2x32xf32>
    %248 = arith.mulf %247, %213 : vector<2x32xf32>
    %249 = arith.addf %244, %248 : vector<2x32xf32>
    %c1_i32_62 = arith.constant 1 : i32
    %250 = vector.broadcast %c1_i32_62 : i32 to vector<2x1xi32>
    %251 = arith.subi %0, %250 : vector<2x1xi32>
    %252 = vector.broadcast %c6_i32 : i32 to vector<2x1xi32>
    %253 = arith.cmpi eq, %251, %252 : vector<2x1xi32>
    %254 = vector.shape_cast %253 : vector<2x1xi1> to vector<2x1xi1>
    %255 = vector.broadcast %254 : vector<2x1xi1> to vector<2x32xi1>
    %256 = arith.select %255, %249, %220 : vector<2x32xi1>, vector<2x32xf32>
    %c7_i32 = arith.constant 7 : i32
    %257 = arith.index_cast %c7_i32 : i32 to index
    %c0_63 = arith.constant 0 : index
    %c0_64 = arith.constant 0 : index
    %258 = vector.load %arg1[%257, %c0_63, %c0_64] : memref<8x2x64xf32, #tpu.memory_space<vmem>>, vector<1x2x64xf32>
    %259 = vector.shape_cast %258 : vector<1x2x64xf32> to vector<2x64xf32>
    %260 = arith.index_cast %c7_i32 : i32 to index
    %c0_65 = arith.constant 0 : index
    %c0_66 = arith.constant 0 : index
    %261 = vector.load %arg2[%260, %c0_65, %c0_66] : memref<8x2x1xf32, #tpu.memory_space<vmem>>, vector<1x2x1xf32>
    %262 = vector.shape_cast %261 : vector<1x2x1xf32> to vector<2x1xf32>
    %cst_67 = arith.constant dense<0.000000e+00> : vector<2x64xf32>
    %263 = tpu.matmul %249, %1, %cst_67 {dimension_numbers = #tpu.dot_dimension_numbers<[1], [0], [0], [1], [0, 0, 1, 1], [], []>} : vector<2x32xf32>, vector<32x64xf32>, vector<2x64xf32> -> vector<2x64xf32>
    %264 = vector.broadcast %2 : vector<1x64xf32> to vector<2x64xf32>
    %265 = arith.addf %263, %264 : vector<2x64xf32>
    %266 = vector.extract_strided_slice %259 {offsets = [0, 0], sizes = [2, 32], strides = [1, 1]} : vector<2x64xf32> to vector<2x32xf32>
    %267 = vector.extract_strided_slice %265 {offsets = [0, 0], sizes = [2, 32], strides = [1, 1]} : vector<2x64xf32> to vector<2x32xf32>
    %268 = arith.addf %266, %267 : vector<2x32xf32>
    %269 = arith.negf %268 : vector<2x32xf32>
    %270 = math.exp %269 : vector<2x32xf32>
    %cst_68 = arith.constant 1.000000e+00 : f32
    %271 = vector.broadcast %cst_68 : f32 to vector<2x32xf32>
    %272 = arith.addf %271, %270 : vector<2x32xf32>
    %273 = arith.divf %271, %272 : vector<2x32xf32>
    %274 = vector.extract_strided_slice %259 {offsets = [0, 32], sizes = [2, 32], strides = [1, 1]} : vector<2x64xf32> to vector<2x32xf32>
    %275 = vector.extract_strided_slice %265 {offsets = [0, 32], sizes = [2, 32], strides = [1, 1]} : vector<2x64xf32> to vector<2x32xf32>
    %276 = arith.mulf %273, %275 : vector<2x32xf32>
    %277 = arith.addf %274, %276 : vector<2x32xf32>
    %278 = math.tanh %277 : vector<2x32xf32>
    %279 = vector.broadcast %262 : vector<2x1xf32> to vector<2x32xf32>
    %280 = arith.mulf %279, %278 : vector<2x32xf32>
    %cst_69 = arith.constant 1.000000e+00 : f32
    %281 = vector.broadcast %cst_69 : f32 to vector<2x1xf32>
    %282 = arith.subf %281, %262 : vector<2x1xf32>
    %283 = vector.broadcast %282 : vector<2x1xf32> to vector<2x32xf32>
    %284 = arith.mulf %283, %249 : vector<2x32xf32>
    %285 = arith.addf %280, %284 : vector<2x32xf32>
    %c1_i32_70 = arith.constant 1 : i32
    %286 = vector.broadcast %c1_i32_70 : i32 to vector<2x1xi32>
    %287 = arith.subi %0, %286 : vector<2x1xi32>
    %288 = vector.broadcast %c7_i32 : i32 to vector<2x1xi32>
    %289 = arith.cmpi eq, %287, %288 : vector<2x1xi32>
    %290 = vector.shape_cast %289 : vector<2x1xi1> to vector<2x1xi1>
    %291 = vector.broadcast %290 : vector<2x1xi1> to vector<2x32xi1>
    %292 = arith.select %291, %285, %256 : vector<2x32xi1>, vector<2x32xf32>
    %c8_i32 = arith.constant 8 : i32
    %c0_71 = arith.constant 0 : index
    %c0_72 = arith.constant 0 : index
    %293 = vector.load %arg6[%c0_71, %c0_72] : memref<2x32xf32, #tpu.memory_space<vmem>>, vector<2x32xf32>
    tpu.vector_store %arg6[%c0_71, %c0_72], %292 {strides = array<i32>} : memref<2x32xf32, #tpu.memory_space<vmem>>, vector<2x32xf32>,
    return
  }
}

</mosaic_0001>

<bundles_post_ra>
// kernel: tpu_custom_call.1
= control target key start
LH: loop header
LB: loop body
LE: loop exit
PB: predicated region body
PF: predicated region fallthrough
CT: control target
= control target key end

     0   :  { %11 = vsyncpa [#allocation3], 0  ;;  %s1581_s0 = inlined_call_operand.vmem [shape: s32[2,1], index: 0, kind: input, shape index: {}]   ;;  %s1582_s1 = inlined_call_operand.hbm [shape: f32[8,2,64], index: 1, kind: input, shape index: {}]   ;;  %s1583_s2 = inlined_call_operand.vmem [shape: f32[8,2,1], index: 2, kind: input, shape index: {}]   ;;  %s1584_s3 = inlined_call_operand.vmem [shape: f32[2,32], index: 3, kind: input, shape index: {}]   ;;  %s1585_s4 = inlined_call_operand.vmem [shape: f32[32,64], index: 4, kind: input, shape index: {}]   ;;  %s1586_s5 = inlined_call_operand.vmem [shape: f32[1,64], index: 5, kind: input, shape index: {}]   ;;  %s1587_s6 = inlined_call_operand.hbm [shape: f32[2,32], index: 6, kind: output, shape index: {}]  }
   0x1   :  { %12 = vsyncpa [#allocation4], 0  ;;  %s1326_s21 = smov [#allocation2]   ;;  %s1278_s25 = scalar_lea.hbm %s1582_s1, 256 }
   0x2   :  { %s20_s22 = sshll.u32 %s1326_s21, 4  ;;  %p1279_p0 = scmp.ne.s32.totalorder %s1582_s1, %s1278_s25  ;;  %s21_s22 = int_to_ptr.vmem [resolvable:$true] %s20_s22 }
   0x3   :  { %p1282_p1 = scmp.lt.u32.totalorder %s1278_s25, %s1582_s1 }
   0x5   :  { %p1284_p2 = pnand %p1282_p1, %p1279_p0 }
   0x7   :  { %1287 = shalt.err (!%p1284_p2)
}
   0x8   :  { %s1288_s30 = scalar_lea.vmem %s21_s22, 256  ;;  %p1293_p4 = scmp.lt.s32.totalorder %s21_s22, %s21_s22 }
   0x9   :  { %p1289_p3 = scmp.ne.s32.totalorder %s21_s22, %s1288_s30  ;;  %p1294_p5 = scmp.lt.s32.totalorder %s1288_s30, %s1288_s30 }
   0xb   :  { %p1295_p6 = por %p1294_p5, %p1293_p4 }
   0xd   :  { %p1296_p7 = pnand %p1295_p6, %p1289_p3 }
   0xf   :  { %1299 = shalt.err (!%p1296_p7)
}
  0x10   :  { %s1327_s7 = smov 32   ;;  %s1328_s8 = smov 2  }
  0x11   :  { %26 = dma.hbm_to_vmem [thread:$0]  %s1582_s1, 256, %s21_s22, [#allocation3], %s1327_s7, %s1327_s7, %s1328_s8  }
  0x12   :  { %1322 = dma.done.wait [#allocation3], 256  }
  0x13   :  { %1323 = vsyncadd [#allocation3], 4294967040  ;;  %v1329_v0 = vmov 0.0|0.0   ;;  %vm1330_vm0 = vmmov 0   ;;  %v1331_v1 = vmov 0.0   ;;  %v39_v2 = vld [vmem:[%s1585_s4] sm:$0xff] }
  0x14   :  { %1171 = vmatprep.subr.bf16.mxu0 %v1329_v0  ;;  %1091 = vmatprep.mubr.msk.f32.mxu0 %vm1330_vm0, %v1331_v1  ;;  %v40_v3 = vld [vmem:[%s1585_s4 + $0x8] sm:$0xff]  ;;  %v41_v4 = vld [vmem:[%s1585_s4 + $0x10] sm:$0xff]  ;;  %v42_v6 = vld [vmem:[%s1585_s4 + $0x18] sm:$0xff]  ;;  %vm53_vm1 = vcmask 261120   ;;  %v1332_v9 = vmov 0   ;;  %s1333_s22 = smov 96  }
  0x15   :  { %1177 = vmatprep.subr.bf16.mxu1 %v1329_v0  ;;  %1102 = vmatprep.mubr.msk.f32.mxu1 %vm1330_vm0, %v1331_v1  ;;  %v1399_v5 = vpack.c.bf16 %v40_v3, %v39_v2  ;;  %v1405_v7 = vpack.c.bf16 %v42_v6, %v41_v4  ;;  %v44_v8 = vld [vmem:[%s1584_s3] sm:$0x3]  ;;  %v45_v16 = vld [vmem:[#allocation2] sm:$0x3]  ;;  %v1022_v37 = vld [vmem:[%s1583_s2 + $0x2] sm:$0x3] }
  0x16   :  { %1228 = vset.pattern.permute.xlu0 %v1332_v9  ;;  %1229 = vset.pattern.permute.xlu1 %v1332_v9  ;;  %v1429_v10 = vld [vmem:[%s1586_s5] ss:$0 sm:$0xff]  ;;  %v172_v38 = vld [vmem:[#allocation2 + $0x2] sm:$0x3]  ;;  %v274_v46 = vsub.f32 1.0, %v1022_v37 }
  0x17   :  { %1173 = vmatpush3.bf16.msra.mxu0 %v1399_v5  ;;  %1179 = vmatpush3.bf16.msra.mxu1 %v1399_v5  ;;  %v46_v12 = vld [vmem:[%s1583_s2] sm:$0x3]  ;;  %v1025_v59 = vld [vmem:[%s1583_s2 + $0x4] sm:$0x3]  ;;  %v290_v60 = vld [vmem:[#allocation2 + $0x4] sm:$0x3] }
  0x18   :  { %1174 = vmatprep.subr.bf16.mxu0 %v1329_v0  ;;  %1180 = vmatprep.subr.bf16.mxu1 %v1329_v0  ;;  %v151_v15 = vsub.f32 1.0, %v46_v12 }
  0x1b   :  { %1176 = vmatpush3.bf16.msra.mxu0 %v1405_v7  ;;  %1182 = vmatpush3.bf16.msra.mxu1 %v1405_v7 }
  0x1c   :  { %1183 = vmatprep.subr.bf16.mxu0 %v1329_v0  ;;  %1189 = vmatprep.subr.bf16.mxu1 %v1329_v0 }
  0x1e   :  { %1092 = vmatmul.mubr.msk.f32.vlgmr.msra.gmra.mrb[0].mxu0 %vm53_vm1, %v44_v8 }
  0x1f   :  { %1185 = vmatpush3.bf16.msra.mxu0 %v1399_v5  ;;  %1113 = vmatprep.mubr.msk.f32.mxu0 %vm1330_vm0, %v1331_v1 }
  0x20   :  { %1186 = vmatprep.subr.bf16.mxu0 %v1329_v0 }
  0x23   :  { %1188 = vmatpush3.bf16.msra.mxu0 %v1405_v7 }
  0x24   :  { %1195 = vmatprep.subr.bf16.mxu0 %v1329_v0 }
  0xf1   :  { %v123_v11 = vpop.f32.mrb[0].mxu0 }
  0xf2   :  { %v124_v13 = vadd.f32 %v1429_v10, %v123_v11  ;;  %v1093_v14 = vpop.f32.mrb[1].mxu0 }
  0xf4   :  { %135 = vrot.lane.b32.xlu0 %v124_v13, %s1333_s22  ;;  %v127_v17 = vadd.f32 %v124_v13, %v45_v16 }
  0xf6   :  { %v1020_v18 = vmul.f32 -1.442695, %v127_v17 }
  0xf8   :  { %154 = vperm.xlu0 %1228, %v151_v15   ;;  %1230 = vpow2.f32 %v1020_v18 }
 0x102   :  { %v1231_v19 = vpop.eup %1230 }
 0x103   :  { %v131_v20 = vadd.f32 1.0, %v1231_v19 }
 0x105   :  { %1232 = vrcp.f32 %v131_v20 }
 0x10f   :  { %v1233_v21 = vpop.eup %1232 }
 0x166   :  { %v136_v22 = vpop.permute.xlu0 %135 }
 0x167   :  { %v138_v23 = vmul.f32 %v1233_v21, %v136_v22 }
 0x169   :  { %140 = vrot.lane.b32.xlu1 %v138_v23, %s1327_s7  ;;  %v1028_v23 = vld [vmem:[%s1583_s2 + $0x6] sm:$0x3] }
 0x16d   :  { %147 = vperm.xlu1 %1229, %v46_v12  }
 0x177   :  { %v155_v24 = vpop.permute.xlu0 %154 }
 0x178   :  { %v157_v25 = vmul.f32 %v155_v24, %v44_v8  ;;  %v392_v8 = vsub.f32 1.0, %v1025_v59  ;;  %v408_v24 = vld [vmem:[#allocation2 + $0x6] sm:$0x3] }
 0x17a   :  { %159 = vrot.lane.b32.xlu1 %v157_v25, %s1327_s7 }
 0x1db   :  { %v141_v26 = vpop.permute.xlu1 %140 }
 0x1dc   :  { %v143_v27 = vadd.f32 %v141_v26, %v45_v16 }
 0x1de   :  { %1234 = vtanh.f32 %v143_v27 }
 0x1e8   :  { %v1235_v29 = vpop.eup %1234 }
 0x1ec   :  { %v148_v28 = vpop.permute.xlu1 %147 }
 0x1ed   :  { %v150_v30 = vmul.f32 %v1235_v29, %v148_v28 }
 0x1f0   :  { %v160_v31 = vpop.permute.xlu1 %159 }
 0x1f1   :  { %v1438_v32 = vadd.f32 %v160_v31, %v150_v30 }
 0x1f3   :  { %176 = vrot.lane.b32.xlu0 %v1438_v32, %s1333_s22 }
 0x265   :  { %v177_v33 = vpop.permute.xlu0 %176 }
 0x266   :  { %1103 = vmatmul.mubr.msk.f32.vlgmr.msra.gmra.mrb[0].mxu1 %vm53_vm1, %v177_v33  ;;  %v510_v33 = vsub.f32 1.0, %v1028_v23 }
 0x267   :  { %1191 = vmatpush3.bf16.msra.mxu1 %v1399_v5  ;;  %1124 = vmatprep.mubr.msk.f32.mxu1 %vm1330_vm0, %v1331_v1 }
 0x268   :  { %1192 = vmatprep.subr.bf16.mxu1 %v1329_v0 }
 0x26b   :  { %1194 = vmatpush3.bf16.msra.mxu1 %v1405_v7 }
 0x26c   :  { %1201 = vmatprep.subr.bf16.mxu1 %v1329_v0 }
 0x339   :  { %v246_v34 = vpop.f32.mrb[0].mxu1 }
 0x33a   :  { %v247_v35 = vadd.f32 %v1429_v10, %v246_v34  ;;  %v1104_v36 = vpop.f32.mrb[1].mxu1 }
 0x33c   :  { %258 = vrot.lane.b32.xlu1 %v247_v35, %s1333_s22  ;;  %v250_v39 = vadd.f32 %v247_v35, %v172_v38 }
 0x33e   :  { %v1024_v40 = vmul.f32 -1.442695, %v250_v39 }
 0x340   :  { %270 = vperm.xlu1 %1229, %v1022_v37   ;;  %1236 = vpow2.f32 %v1024_v40 }
 0x34a   :  { %v1237_v41 = vpop.eup %1236 }
 0x34b   :  { %v254_v42 = vadd.f32 1.0, %v1237_v41 }
 0x34d   :  { %1238 = vrcp.f32 %v254_v42 }
 0x357   :  { %v1239_v43 = vpop.eup %1238 }
 0x3ae   :  { %v259_v44 = vpop.permute.xlu1 %258 }
 0x3af   :  { %v261_v45 = vmul.f32 %v1239_v43, %v259_v44 }
 0x3b1   :  { %263 = vrot.lane.b32.xlu0 %v261_v45, %s1327_s7 }
 0x3b5   :  { %277 = vperm.xlu0 %1228, %v274_v46   ;;  %v1031_v46 = vld [vmem:[%s1583_s2 + $0x8] sm:$0x3] }
 0x3bf   :  { %v271_v50 = vpop.permute.xlu1 %270 }
 0x423   :  { %v264_v47 = vpop.permute.xlu0 %263 }
 0x424   :  { %v266_v48 = vadd.f32 %v264_v47, %v172_v38  ;;  %v526_v47 = vld [vmem:[#allocation2 + $0x8] sm:$0x3] }
 0x426   :  { %1240 = vtanh.f32 %v266_v48 }
 0x430   :  { %v1241_v49 = vpop.eup %1240 }
 0x431   :  { %v273_v52 = vmul.f32 %v1241_v49, %v271_v50 }
 0x434   :  { %v278_v51 = vpop.permute.xlu0 %277 }
 0x435   :  { %v280_v53 = vmul.f32 %v278_v51, %v1438_v32 }
 0x437   :  { %v1456_v54 = vadd.f32 %v280_v53, %v273_v52 }
 0x439   :  { %294 = vrot.lane.b32.xlu1 %v1456_v54, %s1333_s22 }
 0x4ab   :  { %v295_v55 = vpop.permute.xlu1 %294 }
 0x4ac   :  { %1114 = vmatmul.mubr.msk.f32.vlgmr.msra.gmra.mrb[2].mxu0 %vm53_vm1, %v295_v55 }
 0x4ad   :  { %1197 = vmatpush3.bf16.msra.mxu0 %v1399_v5  ;;  %1135 = vmatprep.mubr.msk.f32.mxu0 %vm1330_vm0, %v1331_v1 }
 0x4ae   :  { %1198 = vmatprep.subr.bf16.mxu0 %v1329_v0 }
 0x4b1   :  { %1200 = vmatpush3.bf16.msra.mxu0 %v1405_v7 }
 0x4b2   :  { %1207 = vmatprep.subr.bf16.mxu0 %v1329_v0 }
 0x57f   :  { %v364_v56 = vpop.f32.mrb[2].mxu0 }
 0x580   :  { %v365_v57 = vadd.f32 %v1429_v10, %v364_v56  ;;  %v1115_v58 = vpop.f32.mrb[3].mxu0  ;;  %v628_v56 = vsub.f32 1.0, %v1031_v46 }
 0x582   :  { %376 = vrot.lane.b32.xlu0 %v365_v57, %s1333_s22  ;;  %v368_v61 = vadd.f32 %v365_v57, %v290_v60 }
 0x584   :  { %v1027_v62 = vmul.f32 -1.442695, %v368_v61 }
 0x586   :  { %388 = vperm.xlu0 %1228, %v1025_v59   ;;  %1242 = vpow2.f32 %v1027_v62 }
 0x590   :  { %v1243_v63 = vpop.eup %1242 }
 0x591   :  { %v372_v2 = vadd.f32 1.0, %v1243_v63 }
 0x593   :  { %1244 = vrcp.f32 %v372_v2 }
 0x59d   :  { %v1245_v3 = vpop.eup %1244 }
 0x5f4   :  { %v377_v4 = vpop.permute.xlu0 %376 }
 0x5f5   :  { %v379_v6 = vmul.f32 %v1245_v3, %v377_v4 }
 0x5f7   :  { %381 = vrot.lane.b32.xlu1 %v379_v6, %s1327_s7 }
 0x5fb   :  { %395 = vperm.xlu1 %1229, %v392_v8  }
 0x605   :  { %v389_v14 = vpop.permute.xlu0 %388 }
 0x669   :  { %v382_v11 = vpop.permute.xlu1 %381 }
 0x66a   :  { %v384_v12 = vadd.f32 %v382_v11, %v290_v60  ;;  %v1034_v11 = vld [vmem:[%s1583_s2 + $0xa] sm:$0x3] }
 0x66c   :  { %1246 = vtanh.f32 %v384_v12  ;;  %v644_v12 = vld [vmem:[#allocation2 + $0xa] sm:$0x3] }
 0x676   :  { %v1247_v13 = vpop.eup %1246 }
 0x677   :  { %v391_v16 = vmul.f32 %v1247_v13, %v389_v14 }
 0x67a   :  { %v396_v15 = vpop.permute.xlu1 %395 }
 0x67b   :  { %v398_v17 = vmul.f32 %v396_v15, %v1456_v54 }
 0x67d   :  { %v1474_v18 = vadd.f32 %v398_v17, %v391_v16  ;;  %v746_v16 = vsub.f32 1.0, %v1034_v11 }
 0x67f   :  { %412 = vrot.lane.b32.xlu0 %v1474_v18, %s1333_s22 }
 0x6f1   :  { %v413_v19 = vpop.permute.xlu0 %412 }
 0x6f2   :  { %1125 = vmatmul.mubr.msk.f32.vlgmr.msra.gmra.mrb[2].mxu1 %vm53_vm1, %v413_v19 }
 0x6f3   :  { %1203 = vmatpush3.bf16.msra.mxu1 %v1399_v5  ;;  %1146 = vmatprep.mubr.msk.f32.mxu1 %vm1330_vm0, %v1331_v1 }
 0x6f4   :  { %1204 = vmatprep.subr.bf16.mxu1 %v1329_v0 }
 0x6f7   :  { %1206 = vmatpush3.bf16.msra.mxu1 %v1405_v7 }
 0x6f8   :  { %1213 = vmatprep.subr.bf16.mxu1 %v1329_v0 }
 0x7c5   :  { %v482_v20 = vpop.f32.mrb[2].mxu1 }
 0x7c6   :  { %v483_v21 = vadd.f32 %v1429_v10, %v482_v20  ;;  %v1126_v22 = vpop.f32.mrb[3].mxu1 }
 0x7c8   :  { %494 = vrot.lane.b32.xlu1 %v483_v21, %s1333_s22  ;;  %v486_v25 = vadd.f32 %v483_v21, %v408_v24 }
 0x7ca   :  { %v1030_v26 = vmul.f32 -1.442695, %v486_v25 }
 0x7cc   :  { %506 = vperm.xlu1 %1229, %v1028_v23   ;;  %1248 = vpow2.f32 %v1030_v26 }
 0x7d6   :  { %v1249_v27 = vpop.eup %1248 }
 0x7d7   :  { %v490_v28 = vadd.f32 1.0, %v1249_v27 }
 0x7d9   :  { %1250 = vrcp.f32 %v490_v28 }
 0x7e3   :  { %v1251_v29 = vpop.eup %1250 }
 0x83a   :  { %v495_v30 = vpop.permute.xlu1 %494 }
 0x83b   :  { %v497_v31 = vmul.f32 %v1251_v29, %v495_v30  ;;  %v1037_v30 = vld [vmem:[%s1583_s2 + $0xc] sm:$0x3] }
 0x83d   :  { %499 = vrot.lane.b32.xlu0 %v497_v31, %s1327_s7  ;;  %v762_v31 = vld [vmem:[#allocation2 + $0xc] sm:$0x3] }
 0x841   :  { %513 = vperm.xlu0 %1228, %v510_v33  }
 0x84b   :  { %v507_v37 = vpop.permute.xlu1 %506 }
 0x8af   :  { %v500_v34 = vpop.permute.xlu0 %499 }
 0x8b0   :  { %v502_v35 = vadd.f32 %v500_v34, %v408_v24 }
 0x8b2   :  { %1252 = vtanh.f32 %v502_v35 }
 0x8bc   :  { %v1253_v36 = vpop.eup %1252 }
 0x8bd   :  { %v509_v39 = vmul.f32 %v1253_v36, %v507_v37 }
 0x8c0   :  { %v514_v38 = vpop.permute.xlu0 %513 }
 0x8c1   :  { %v516_v40 = vmul.f32 %v514_v38, %v1474_v18 }
 0x8c3   :  { %v1492_v41 = vadd.f32 %v516_v40, %v509_v39  ;;  %v864_v40 = vsub.f32 1.0, %v1037_v30 }
 0x8c5   :  { %530 = vrot.lane.b32.xlu1 %v1492_v41, %s1333_s22 }
 0x937   :  { %v531_v42 = vpop.permute.xlu1 %530 }
 0x938   :  { %1136 = vmatmul.mubr.msk.f32.vlgmr.msra.gmra.mrb[4].mxu0 %vm53_vm1, %v531_v42 }
 0x939   :  { %1209 = vmatpush3.bf16.msra.mxu0 %v1399_v5  ;;  %1157 = vmatprep.mubr.msk.f32.mxu0 %vm1330_vm0, %v1331_v1 }
 0x93a   :  { %1210 = vmatprep.subr.bf16.mxu0 %v1329_v0 }
 0x93d   :  { %1212 = vmatpush3.bf16.msra.mxu0 %v1405_v7 }
 0xa0b   :  { %v600_v43 = vpop.f32.mrb[4].mxu0 }
 0xa0c   :  { %v601_v44 = vadd.f32 %v1429_v10, %v600_v43  ;;  %v1137_v45 = vpop.f32.mrb[5].mxu0 }
 0xa0e   :  { %612 = vrot.lane.b32.xlu0 %v601_v44, %s1333_s22  ;;  %v604_v48 = vadd.f32 %v601_v44, %v526_v47  ;;  %v38_v44 = vld [vmem:[%s1581_s0] sm:$0x3] }
 0xa10   :  { %v1033_v49 = vmul.f32 -1.442695, %v604_v48 }
 0xa12   :  { %624 = vperm.xlu0 %1228, %v1031_v46   ;;  %1254 = vpow2.f32 %v1033_v49  ;;  %v1021_v46 = vadd.s32 4294967295, %v38_v44 }
 0xa14   :  { %vm282_vm2 = vcmp.eq.s32.totalorder %v1021_v46, 1  ;;  %vm518_vm3 = vcmp.eq.s32.totalorder %v1021_v46, 3  ;;  %vm164_vm4 = vcmp.eq.s32.totalorder %v1021_v46, 0  ;;  %vm400_vm5 = vcmp.eq.s32.totalorder %v1021_v46, 2 }
 0xa15   :  { %vm636_vm6 = vcmp.eq.s32.totalorder %v1021_v46, 4  ;;  %vm872_vm7 = vcmp.eq.s32.totalorder %v1021_v46, 6  ;;  %vm754_vm8 = vcmp.eq.s32.totalorder %v1021_v46, 5  ;;  %vm990_vm9 = vcmp.eq.s32.totalorder %v1021_v46, 7 }
 0xa1c   :  { %v1255_v50 = vpop.eup %1254 }
 0xa1d   :  { %v608_v51 = vadd.f32 1.0, %v1255_v50 }
 0xa1f   :  { %1256 = vrcp.f32 %v608_v51 }
 0xa29   :  { %v1257_v52 = vpop.eup %1256 }
 0xa80   :  { %v613_v53 = vpop.permute.xlu0 %612 }
 0xa81   :  { %v615_v55 = vmul.f32 %v1257_v52, %v613_v53  ;;  %v283_v52 = vsel %vm282_vm2, 1, %v1332_v9  ;;  %v519_v53 = vsel %vm518_vm3, 1, %v1332_v9  ;;  %vm1001_vm2 = vcmask 254976  }
 0xa83   :  { %617 = vrot.lane.b32.xlu1 %v615_v55, %s1327_s7 }
 0xa87   :  { %631 = vperm.xlu1 %1229, %v628_v56  }
 0xa91   :  { %v625_v60 = vpop.permute.xlu0 %624 }
 0xaf5   :  { %v618_v57 = vpop.permute.xlu1 %617 }
 0xaf6   :  { %v620_v58 = vadd.f32 %v618_v57, %v526_v47 }
 0xaf8   :  { %1258 = vtanh.f32 %v620_v58 }
 0xb02   :  { %v1259_v59 = vpop.eup %1258 }
 0xb03   :  { %v627_v62 = vmul.f32 %v1259_v59, %v625_v60  ;;  %v165_v59 = vsel %vm164_vm4, 1, %v1332_v9  ;;  %v401_v60 = vsel %vm400_vm5, 1, %v1332_v9 }
 0xb06   :  { %v632_v61 = vpop.permute.xlu1 %631 }
 0xb07   :  { %v634_v63 = vmul.f32 %v632_v61, %v1492_v41  ;;  %v637_v61 = vsel %vm636_vm6, 1, %v1332_v9 }
 0xb09   :  { %v1509_v2 = vadd.f32 %v634_v63, %v627_v62  ;;  %v1040_v62 = vld [vmem:[%s1583_s2 + $0xe] sm:$0x3]  ;;  %v873_v63 = vsel %vm872_vm7, 1, %v1332_v9  ;;  %s1334_s2 = smov [#allocation5]  }
 0xb0b   :  { %648 = vrot.lane.b32.xlu0 %v1509_v2, %s1333_s22 }
 0xb7d   :  { %v649_v3 = vpop.permute.xlu0 %648 }
 0xb7e   :  { %1147 = vmatmul.mubr.msk.f32.vlgmr.msra.gmra.mrb[4].mxu1 %vm53_vm1, %v649_v3  ;;  %v880_v3 = vld [vmem:[#allocation2 + $0xe] sm:$0x3] }
 0xb7f   :  { %1215 = vmatpush3.bf16.msra.mxu1 %v1399_v5  ;;  %1168 = vmatprep.mubr.msk.f32.mxu1 %vm1330_vm0, %v1331_v1 }
 0xb80   :  { %1216 = vmatprep.subr.bf16.mxu1 %v1329_v0 }
 0xb83   :  { %1218 = vmatpush3.bf16.msra.mxu1 %v1405_v7 }
 0xc51   :  { %v718_v4 = vpop.f32.mrb[4].mxu1 }
 0xc52   :  { %v719_v6 = vadd.f32 %v1429_v10, %v718_v4  ;;  %v1148_v8 = vpop.f32.mrb[5].mxu1 }
 0xc54   :  { %730 = vrot.lane.b32.xlu1 %v719_v6, %s1333_s22  ;;  %v722_v5 = vadd.f32 %v719_v6, %v644_v12 }
 0xc56   :  { %v1036_v13 = vmul.f32 -1.442695, %v722_v5 }
 0xc58   :  { %742 = vperm.xlu1 %1229, %v1034_v11   ;;  %1260 = vpow2.f32 %v1036_v13 }
 0xc62   :  { %v1261_v1 = vpop.eup %1260 }
 0xc63   :  { %v726_v14 = vadd.f32 1.0, %v1261_v1  ;;  %v755_v1 = vsel %vm754_vm8, 1, %v1332_v9 }
 0xc65   :  { %1262 = vrcp.f32 %v726_v14  ;;  %v991_v14 = vsel %vm990_vm9, 1, %v1332_v9 }
 0xc6f   :  { %v1263_v0 = vpop.eup %1262 }
 0xcc6   :  { %v731_v7 = vpop.permute.xlu1 %730 }
 0xcc7   :  { %v733_v15 = vmul.f32 %v1263_v0, %v731_v7 }
 0xcc9   :  { %735 = vrot.lane.b32.xlu0 %v733_v15, %s1327_s7 }
 0xccd   :  { %749 = vperm.xlu0 %1228, %v746_v16  }
 0xcd7   :  { %v743_v21 = vpop.permute.xlu1 %742 }
 0xd3b   :  { %v736_v17 = vpop.permute.xlu0 %735 }
 0xd3c   :  { %v738_v19 = vadd.f32 %v736_v17, %v644_v12 }
 0xd3e   :  { %1264 = vtanh.f32 %v738_v19 }
 0xd48   :  { %v1265_v20 = vpop.eup %1264 }
 0xd49   :  { %v745_v23 = vmul.f32 %v1265_v20, %v743_v21 }
 0xd4c   :  { %v750_v22 = vpop.permute.xlu0 %749 }
 0xd4d   :  { %v752_v24 = vmul.f32 %v750_v22, %v1509_v2 }
 0xd4f   :  { %v1526_v25 = vadd.f32 %v752_v24, %v745_v23 }
 0xd51   :  { %766 = vrot.lane.b32.xlu1 %v1526_v25, %s1333_s22 }
 0xdc3   :  { %v767_v26 = vpop.permute.xlu1 %766 }
 0xdc4   :  { %1158 = vmatmul.mubr.msk.f32.vlgmr.msra.gmra.mrb[6].mxu0 %vm53_vm1, %v767_v26 }
 0xe97   :  { %v836_v27 = vpop.f32.mrb[6].mxu0 }
 0xe98   :  { %v837_v28 = vadd.f32 %v1429_v10, %v836_v27  ;;  %v1159_v29 = vpop.f32.mrb[7].mxu0 }
 0xe9a   :  { %848 = vrot.lane.b32.xlu0 %v837_v28, %s1333_s22  ;;  %v840_v33 = vadd.f32 %v837_v28, %v762_v31 }
 0xe9c   :  { %v1039_v34 = vmul.f32 -1.442695, %v840_v33 }
 0xe9e   :  { %860 = vperm.xlu0 %1228, %v1037_v30   ;;  %1266 = vpow2.f32 %v1039_v34 }
 0xea8   :  { %v1267_v35 = vpop.eup %1266 }
 0xea9   :  { %v844_v36 = vadd.f32 1.0, %v1267_v35 }
 0xeab   :  { %1268 = vrcp.f32 %v844_v36 }
 0xeb5   :  { %v1269_v37 = vpop.eup %1268 }
 0xf0c   :  { %v849_v38 = vpop.permute.xlu0 %848 }
 0xf0d   :  { %v851_v39 = vmul.f32 %v1269_v37, %v849_v38 }
 0xf0f   :  { %853 = vrot.lane.b32.xlu1 %v851_v39, %s1327_s7 }
 0xf13   :  { %867 = vperm.xlu1 %1229, %v864_v40  }
 0xf1d   :  { %v861_v47 = vpop.permute.xlu0 %860 }
 0xf81   :  { %v854_v42 = vpop.permute.xlu1 %853 }
 0xf82   :  { %v856_v43 = vadd.f32 %v854_v42, %v762_v31 }
 0xf84   :  { %1270 = vtanh.f32 %v856_v43 }
 0xf8e   :  { %v1271_v45 = vpop.eup %1270 }
 0xf8f   :  { %v863_v49 = vmul.f32 %v1271_v45, %v861_v47 }
 0xf92   :  { %v868_v48 = vpop.permute.xlu1 %867 }
 0xf93   :  { %v870_v50 = vmul.f32 %v868_v48, %v1526_v25 }
 0xf95   :  { %v1541_v51 = vadd.f32 %v870_v50, %v863_v49 }
 0xf97   :  { %884 = vrot.lane.b32.xlu0 %v1541_v51, %s1333_s22 }
 0xf9b   :  { %285 = vperm.xlu0 %1228, %v283_v52  }
 0xf9f   :  { %521 = vperm.xlu0 %1228, %v519_v53  }
0x1009   :  { %v885_v55 = vpop.permute.xlu0 %884 }
0x100a   :  { %1169 = vmatmul.mubr.msk.f32.vlgmr.msra.gmra.mrb[6].mxu1 %vm53_vm1, %v885_v55 }
0x101a   :  { %v286_v0 = vpop.permute.xlu0 %285 }
0x101b   :  { %vm287_vm12 = vcmp.eq.s32.totalorder %v286_v0, 1 }
0x101e   :  { %v522_v15 = vpop.permute.xlu0 %521 }
0x101f   :  { %vm523_vm14 = vcmp.eq.s32.totalorder %v522_v15, 1 }
0x10dd   :  { %v954_v56 = vpop.f32.mrb[6].mxu1 }
0x10de   :  { %v955_v57 = vadd.f32 %v1429_v10, %v954_v56  ;;  %v1170_v58 = vpop.f32.mrb[7].mxu1  ;;  %v982_v10 = vsub.f32 1.0, %v1040_v62 }
0x10e0   :  { %966 = vrot.lane.b32.xlu1 %v955_v57, %s1333_s22  ;;  %v958_v4 = vadd.f32 %v955_v57, %v880_v3 }
0x10e2   :  { %v1042_v6 = vmul.f32 -1.442695, %v958_v4 }
0x10e4   :  { %167 = vperm.xlu1 %1229, %v165_v59   ;;  %1272 = vpow2.f32 %v1042_v6 }
0x10e8   :  { %403 = vperm.xlu1 %1229, %v401_v60  }
0x10ec   :  { %639 = vperm.xlu1 %1229, %v637_v61  }
0x10ee   :  { %v1273_v8 = vpop.eup %1272 }
0x10ef   :  { %v962_v11 = vadd.f32 1.0, %v1273_v8 }
0x10f0   :  { %985 = vperm.xlu1 %1229, %v982_v10  }
0x10f1   :  { %1274 = vrcp.f32 %v962_v11 }
0x10f4   :  { %875 = vperm.xlu1 %1229, %v873_v63  }
0x10fb   :  { %v1275_v12 = vpop.eup %1274 }
0x1152   :  { %v967_v5 = vpop.permute.xlu1 %966 }
0x1153   :  { %v969_v13 = vmul.f32 %v1275_v12, %v967_v5 }
0x1155   :  { %971 = vrot.lane.b32.xlu0 %v969_v13, %s1327_s7  ;;  %s1009_s7 = sshll.u32 %s1334_s2, 4  ;;  %s1010_s7 = int_to_ptr.vmem [resolvable:$true] %s1009_s7 }
0x1156   :  { %s1300_s13 = scalar_lea.vmem %s1010_s7, 32  ;;  %p1305_p9 = scmp.lt.s32.totalorder %s1010_s7, %s1010_s7 }
0x1157   :  { %p1301_p8 = scmp.ne.s32.totalorder %s1010_s7, %s1300_s13  ;;  %p1306_p10 = scmp.lt.s32.totalorder %s1300_s13, %s1300_s13 }
0x1159   :  { %978 = vperm.xlu0 %1228, %v1040_v62   ;;  %p1307_p11 = por %p1306_p10, %p1305_p9 }
0x115b   :  { %p1308_p12 = pnand %p1307_p11, %p1301_p8 }
0x115d   :  { %757 = vperm.xlu0 %1228, %v755_v1  }
0x1161   :  { %993 = vperm.xlu0 %1228, %v991_v14  }
0x1163   :  { %v168_v7 = vpop.permute.xlu1 %167 }
0x1164   :  { %vm169_vm10 = vcmp.eq.s32.totalorder %v168_v7, 1 }
0x1165   :  { %v170_v21 = vsel %vm169_vm10, %v1438_v32, 0.0 }
0x1166   :  { %v288_v23 = vsel %vm287_vm12, %v1456_v54, %v170_v21 }
0x1167   :  { %v404_v17 = vpop.permute.xlu1 %403 }
0x1168   :  { %vm405_vm11 = vcmp.eq.s32.totalorder %v404_v17, 1 }
0x1169   :  { %v406_v9 = vsel %vm405_vm11, %v1474_v18, %v288_v23 }
0x116a   :  { %v524_v27 = vsel %vm523_vm14, %v1492_v41, %v406_v9 }
0x116b   :  { %v640_v20 = vpop.permute.xlu1 %639 }
0x116c   :  { %vm641_vm13 = vcmp.eq.s32.totalorder %v640_v20, 1 }
0x116d   :  { %v642_v30 = vsel %vm641_vm13, %v1509_v2, %v524_v27 }
0x116f   :  { %v986_v22 = vpop.permute.xlu1 %985 }
0x1170   :  { %v988_v32 = vmul.f32 %v986_v22, %v1541_v51 }
0x1173   :  { %v876_v31 = vpop.permute.xlu1 %875 }
0x1174   :  { %vm877_vm0 = vcmp.eq.s32.totalorder %v876_v31, 1 }
0x11c7   :  { %v972_v16 = vpop.permute.xlu0 %971 }
0x11c8   :  { %v974_v19 = vadd.f32 %v972_v16, %v880_v3 }
0x11ca   :  { %1276 = vtanh.f32 %v974_v19 }
0x11d4   :  { %v1277_v26 = vpop.eup %1276 }
0x11d8   :  { %v979_v24 = vpop.permute.xlu0 %978 }
0x11d9   :  { %v981_v28 = vmul.f32 %v1277_v26, %v979_v24 }
0x11db   :  { %v989_v54 = vadd.f32 %v988_v32, %v981_v28 }
0x11dc   :  { %v758_v29 = vpop.permute.xlu0 %757 }
0x11dd   :  { %vm759_vm15 = vcmp.eq.s32.totalorder %v758_v29, 1 }
0x11de   :  { %v760_v33 = vsel %vm759_vm15, %v1526_v25, %v642_v30 }
0x11df   :  { %v878_v18 = vsel %vm877_vm0, %v1541_v51, %v760_v33 }
0x11e0   :  { %v994_v34 = vpop.permute.xlu0 %993 }
0x11e1   :  { %vm995_vm1 = vcmp.eq.s32.totalorder %v994_v34, 1 }
0x11e2   :  { %v996_v35 = vsel %vm995_vm1, %v989_v54, %v878_v18 }
0x11e3   :  { %998 = vrot.lane.b32.xlu1 %v996_v35, %s1333_s22 }
0x1255   :  { %v999_v41 = vpop.permute.xlu1 %998 }
0x1256   :  { %1002 = vst.msk [vmem:[#allocation5] sm:$0x3] %vm1001_vm2, %v999_v41 }
0x1257   :  { %1311 = shalt.err (!%p1308_p12)
}
0x1258   :  { %s1312_s16 = scalar_lea.hbm %s1587_s6, 32 }
0x1259   :  { %p1313_p13 = scmp.ne.s32.totalorder %s1587_s6, %s1312_s16  ;;  %p1316_p0 = scmp.lt.u32.totalorder %s1312_s16, %s1587_s6 }
0x125b   :  { %p1318_p1 = pnand %p1316_p0, %p1313_p13 }
0x125d   :  { %1321 = shalt.err (!%p1318_p1)
}
0x125e   :  { %1012 = dma.vmem_to_hbm [thread:$0]  %s1010_s7, 32, %s1587_s6, [#allocation4]  }
0x125f   :  { %1324 = dma.done.wait [#allocation4], 32  }
0x1260   :  { %1325 = vsyncadd [#allocation4], 4294967264 }
0x1261   :  { %1016 = vsyncpa [#allocation3], 1 }
0x1262   :  { %1017 = vsyncpa [#allocation4], 1 }

</bundles_post_ra>
